<compile_context>
chip_gen: v7x
topology: tpu7x:2x2x1
jax: 0.10.0
libtpu: 0.0.40
codegen_flags: <defaults>
</compile_context>

<pallas_src>
import functools
import math

import jax
import jax.numpy as jnp
from jax.experimental import pallas as pl
from jax.experimental.pallas import tpu as pltpu


def _maxpool3d_tiled_kernel(x_ref, o_ref, *, pool):
    """Fast path: stride == pool (module default, non-overlapping windows).

    x_ref: (t_do * pd, Ho * ph, Wo * pw, N, C)   o_ref: (t_do, Ho, Wo, N, C)
    """
    pd, ph, pw = pool
    d_in, hc, wc, n, c = x_ref.shape
    d_out, ho, wo = d_in // pd, hc // ph, wc // pw
    x = x_ref[...]
    # Window reductions via leading-dim-only reshapes (the minor (N, C) dims
    # are never touched, so these are layout-preserving) + max over the split
    # window axis.  Pure VPU work, no XLU shuffles, no small masked stores.
    x = jnp.max(x.reshape(d_out, pd, hc, wc, n, c), axis=1)
    x = jnp.max(x.reshape(d_out, ho, ph, wc, n, c), axis=2)
    x = jnp.max(x.reshape(d_out, ho, wo, pw, n, c), axis=3)
    o_ref[...] = x.astype(o_ref.dtype)          # single large store per block


def _maxpool3d_general_kernel(x_ref, o_ref, *, pool, stride, out_spatial):
    """Fallback for stride != pool (overlapping or skipping windows).

    Only unit-stride slices, leading-axis reductions and a leading-axis stack;
    slower (Python-unrolled over output D, H) but only reached for non-default
    stride configurations.
    """
    pd, ph, pw = pool
    sd, sh, sw = stride
    do, ho, wo = out_spatial
    for od in range(do):
        for oh in range(ho):
            slab = x_ref[od * sd:od * sd + pd, oh * sh:oh * sh + ph, :, :, :]
            plane = jnp.max(slab, axis=(0, 1))                        # (W, N, C)
            wins = jnp.stack(
                [plane[ow * sw:ow * sw + pw] for ow in range(wo)], axis=0
            )                                                         # (Wo, pw, N, C)
            o_ref[od, oh, :, :, :] = jnp.max(wins, axis=1)            # (Wo, N, C)


def max_pooling_3d(x_ncdhw, pool, p2=None, p3=None, s1=None, s2=None, s3=None):
    """Replicates MaxPooling3D.forward (incl. its zero-padding rule) on NCDHW input."""
    # --- torch-module default resolution (__init__) ---
    if p2 is None:
        p2 = pool
    if p3 is None:
        p3 = p2
    pool_size = (int(pool), int(p2), int(p3))
    if s1 is None:
        s1 = pool
    if s2 is None:
        s2 = p2
    if s3 is None:
        s3 = p3
    stride = (int(s1), int(s2), int(s3))

    # --- replicate MaxPooling3D.pad: zero-pad (ceil-left, floor-right) when a
    #     spatial dim is smaller than the pooling window ---
    n, c, d, h, w = x_ncdhw.shape

    def _pads(p, dim):
        diff = max(p - dim, 0)
        return (int(math.ceil(diff / 2)), diff // 2)

    pads = (_pads(pool_size[0], d), _pads(pool_size[1], h), _pads(pool_size[2], w))
    if any(sum(p) for p in pads):
        x_ncdhw = jnp.pad(x_ncdhw, ((0, 0), (0, 0)) + pads)
    n, c, d, h, w = x_ncdhw.shape

    pd, ph, pw = pool_size
    sd, sh, sw = stride
    do = (d - pd) // sd + 1
    ho = (h - ph) // sh + 1
    wo = (w - pw) // sw + 1

    # (N, C, D, H, W) -> (D, H, W, N, C): pooled dims leading, channels on the
    # lane dim.  allow_input_fusion lets XLA fuse this transpose into the
    # pallas_call operand rather than materialising an extra HBM pass.
    x = jnp.transpose(x_ncdhw, (2, 3, 4, 0, 1))
    itemsize = x.dtype.itemsize

    # VMEM-padded footprint of one (h, w) "row": the last two dims are tiled
    # to (8 * packing, 128), so small (N, C) pay a padding tax that the tile
    # chooser must account for (v5e scoped default is only 16 MiB).
    sub_tile = 8 * max(1, 4 // itemsize)
    padded_nc = (-(-n // sub_tile) * sub_tile) * (-(-c // 128) * 128) * itemsize

    fast = pool_size == stride
    if fast:
        # Tile the output-D axis: biggest divisor of Do whose input block fits
        # the budget, preferring >= 2 grid steps (v7x has 2 TensorCores).
        in_bytes_per_od = pd * (ho * ph) * (wo * pw) * padded_nc
        out_bytes_per_od = ho * wo * padded_nc
        budget = 3 * 1024 * 1024
        divisors = [t for t in range(1, do + 1) if do % t == 0]
        fitting = [t for t in divisors if t * in_bytes_per_od <= budget] or [1]
        multi = [t for t in fitting if do // t >= 2]
        t_do = max(multi) if multi else max(fitting)
        n_tiles = do // t_do

        kernel = functools.partial(_maxpool3d_tiled_kernel, pool=pool_size)
        grid = (n_tiles,)
        # Input block only covers the [0, Ho*ph) x [0, Wo*pw) region actually
        # consumed by VALID pooling -> no in-kernel crop, no wasted DMA.
        in_specs = [pl.BlockSpec((t_do * pd, ho * ph, wo * pw, n, c),
                                 lambda t: (t, 0, 0, 0, 0))]
        out_specs = pl.BlockSpec((t_do, ho, wo, n, c), lambda t: (t, 0, 0, 0, 0))
        need = 2 * t_do * (in_bytes_per_od + out_bytes_per_od)
    else:
        # TODO(synk): general-stride path keeps the whole volume resident (no
        # halo-aware D tiling); fine for the module's use, not VMEM-tiled.
        kernel = functools.partial(_maxpool3d_general_kernel, pool=pool_size,
                                   stride=stride, out_spatial=(do, ho, wo))
        grid = (1,)
        in_specs = [pl.BlockSpec((d, h, w, n, c), lambda t: (0, 0, 0, 0, 0))]
        out_specs = pl.BlockSpec((do, ho, wo, n, c), lambda t: (0, 0, 0, 0, 0))
        need = 2 * (d * h * w + do * ho * wo) * padded_nc

    params = dict(dimension_semantics=("parallel",), allow_input_fusion=[True])
    if need > 12 * 1024 * 1024:
        params["vmem_limit_bytes"] = min(int(need) + (8 << 20), 110 << 20)

    out = pl.pallas_call(
        kernel,
        out_shape=jax.ShapeDtypeStruct((do, ho, wo, n, c), x.dtype),
        grid_spec=pltpu.PrefetchScalarGridSpec(
            num_scalar_prefetch=0,
            grid=grid,
            in_specs=in_specs,
            out_specs=out_specs,
        ),
        compiler_params=pltpu.CompilerParams(**params),
    )(x)

    # (Do, Ho, Wo, N, C) -> (N, C, Do, Ho, Wo); output is pool-volume x smaller
    # than the input, so this transpose is cheap relative to the kernel's read.
    return jnp.transpose(out, (3, 4, 0, 1, 2))


if __name__ == "__main__":
    key = jax.random.PRNGKey(0)

    # 1) Default config: pool_size = stride = (2, 2, 2) -> tiled fast path.
    N, C, D, H, W = 2, 4, 6, 8, 8
    x = jax.random.normal(key, (N, C, D, H, W), dtype=jnp.float32)
    pool = 2
    y = max_pooling_3d(x, pool)
    jax.block_until_ready(y)
    ref = jax.lax.reduce_window(
        x, -jnp.inf, jax.lax.max,
        window_dimensions=(1, 1, pool, pool, pool),
        window_strides=(1, 1, pool, pool, pool),
        padding="VALID")
    assert y.shape == ref.shape, (y.shape, ref.shape)
    assert jnp.allclose(y, ref), "mismatch (default stride == pool path)"

    # 2) Spatial dim smaller than the window: exercises the module's zero-pad rule.
    x2 = jax.random.normal(jax.random.PRNGKey(1), (1, 3, 1, 4, 5), dtype=jnp.float32)
    y2 = max_pooling_3d(x2, pool)
    jax.block_until_ready(y2)
    x2_pad = jnp.pad(x2, ((0, 0), (0, 0), (1, 0), (0, 0), (0, 0)))
    ref2 = jax.lax.reduce_window(
        x2_pad, -jnp.inf, jax.lax.max,
        window_dimensions=(1, 1, 2, 2, 2), window_strides=(1, 1, 2, 2, 2),
        padding="VALID")
    assert y2.shape == ref2.shape and jnp.allclose(y2, ref2), "mismatch (padded path)"

    # 3) Non-default (overlapping) strides: exercises the general fallback kernel.
    y3 = max_pooling_3d(x, 2, s1=1, s2=1, s3=1)
    jax.block_until_ready(y3)
    ref3 = jax.lax.reduce_window(
        x, -jnp.inf, jax.lax.max,
        window_dimensions=(1, 1, 2, 2, 2), window_strides=(1, 1, 1, 1, 1),
        padding="VALID")
    assert y3.shape == ref3.shape and jnp.allclose(y3, ref3), "mismatch (general stride path)"

    print("KERNEL_OK")
</pallas_src>

<mosaic_0001>
module attributes {stable_mosaic.version = 11 : i64} {
  func.func @_maxpool3d_tiled_kernel(%arg0: i32, %arg1: memref<2x8x8x2x4xf32, #tpu.memory_space<vmem>>, %arg2: memref<1x4x4x2x4xf32, #tpu.memory_space<vmem>>) attributes {dimension_semantics = [#tpu.dimension_semantics<parallel>], iteration_bounds = array<i64: 3>, scalar_prefetch = 0 : i64, scratch_operands = 0 : i64, tpu.core_type = #tpu.core_type<tc>, window_params = [{transform_indices = @transform_0, window_bounds = array<i64: 2, 8, 8, 2, 4>}, {transform_indices = @transform_1, window_bounds = array<i64: 1, 4, 4, 2, 4>}]} {
    %c0 = arith.constant 0 : index
    %c0_0 = arith.constant 0 : index
    %c0_1 = arith.constant 0 : index
    %c0_2 = arith.constant 0 : index
    %c0_3 = arith.constant 0 : index
    %0 = vector.load %arg1[%c0, %c0_0, %c0_1, %c0_2, %c0_3] : memref<2x8x8x2x4xf32, #tpu.memory_space<vmem>>, vector<2x8x8x2x4xf32>
    %1 = vector.shape_cast %0 : vector<2x8x8x2x4xf32> to vector<1x2x8x8x2x4xf32>
    %cst = arith.constant dense<0xFF800000> : vector<1x8x8x2x4xf32>
    %2 = vector.multi_reduction <maximumf>, %1, %cst [1] : vector<1x2x8x8x2x4xf32> to vector<1x8x8x2x4xf32>
    %3 = vector.shape_cast %2 : vector<1x8x8x2x4xf32> to vector<1x4x2x8x2x4xf32>
    %cst_4 = arith.constant dense<0xFF800000> : vector<1x4x8x2x4xf32>
    %4 = vector.multi_reduction <maximumf>, %3, %cst_4 [2] : vector<1x4x2x8x2x4xf32> to vector<1x4x8x2x4xf32>
    %5 = vector.shape_cast %4 : vector<1x4x8x2x4xf32> to vector<1x4x4x2x2x4xf32>
    %cst_5 = arith.constant dense<0xFF800000> : vector<1x4x4x2x4xf32>
    %6 = vector.multi_reduction <maximumf>, %5, %cst_5 [3] : vector<1x4x4x2x2x4xf32> to vector<1x4x4x2x4xf32>
    %c0_6 = arith.constant 0 : index
    %c0_7 = arith.constant 0 : index
    %c0_8 = arith.constant 0 : index
    %c0_9 = arith.constant 0 : index
    %c0_10 = arith.constant 0 : index
    %7 = vector.load %arg2[%c0_6, %c0_7, %c0_8, %c0_9, %c0_10] : memref<1x4x4x2x4xf32, #tpu.memory_space<vmem>>, vector<1x4x4x2x4xf32>
    tpu.vector_store %arg2[%c0_6, %c0_7, %c0_8, %c0_9, %c0_10], %6 {strides = array<i32>} : memref<1x4x4x2x4xf32, #tpu.memory_space<vmem>>, vector<1x4x4x2x4xf32>,
    return
  }
  func.func @transform_0(%arg0: i32) -> (i32, i32, i32, i32, i32) {
    %c0_i32 = arith.constant 0 : i32
    %c0_i32_0 = arith.constant 0 : i32
    %c0_i32_1 = arith.constant 0 : i32
    %c0_i32_2 = arith.constant 0 : i32
    %c0_i32_3 = arith.constant 0 : i32
    return %arg0, %c0_i32, %c0_i32_0, %c0_i32_1, %c0_i32_2 : i32, i32, i32, i32, i32
  }
  func.func @transform_1(%arg0: i32) -> (i32, i32, i32, i32, i32) {
    %c0_i32 = arith.constant 0 : i32
    %c0_i32_0 = arith.constant 0 : i32
    %c0_i32_1 = arith.constant 0 : i32
    %c0_i32_2 = arith.constant 0 : i32
    %c0_i32_3 = arith.constant 0 : i32
    return %arg0, %c0_i32, %c0_i32_0, %c0_i32_1, %c0_i32_2 : i32, i32, i32, i32, i32
  }
}

</mosaic_0001>

<bundles_post_ra>
// kernel: tpu_custom_call.1
= control target key start
LH: loop header
LB: loop body
LE: loop exit
PB: predicated region body
PF: predicated region fallthrough
CT: control target
= control target key end

     0   :  { %6 = vsyncpa [#allocation3], 0  ;;  %s1308_s0 = inlined_call_operand.vmem [shape: f32[6,8,8,2,4], index: 0, kind: input, shape index: {}]   ;;  %s1309_s1 = inlined_call_operand.hbm [shape: f32[3,4,4,2,4], index: 1, kind: output, shape index: {}]  }
   0x1   :  { %8 = vsyncpa [#allocation3 + $0x1], 0  ;;  %s810_s6 = smov 0   ;;  %s812_s7 = smov 0  }
   0x2   :  { %s814_s8 = smov 0   ;;  %s816_s9 = smov 0  }
   0x3 LB: > { %s831_s10 = sadd.s32 4294967295, %s795_s9   ;;  %s677_s11 = sadd.s32 4294967294, %s795_s9   ;;  %s795_s9 = sphi %s816_s9, %s1315_s9   ;;  %s791_s8 = sphi %s814_s8, %s1314_s8   ;;  %s787_s7 = sphi %s812_s7, %s1313_s7   ;;  %s783_s6 = sphi %s810_s6, %s1312_s6  }
   0x4   : > { %s835_s12 = sadd.s32 1, %s795_s9   ;;  %s47_s13 = sadd.s32 1, %s791_s8 }
   0x5   : > { %s44_s14 = ssub.s32 %s795_s9, %s835_s12  ;;  %p57_p0 = scmp.ne.s32.totalorder %s791_s8, %s787_s7 }
   0x6   : > { %p45_p1 = scmp.eq.s32.totalorder %s44_s14, 0  ;;  %p58_p2 = scmp.eq.s32.totalorder %s831_s10, 2 }
   0x7   : > { %p63_p3 = scmp.ne.s32.totalorder %s787_s7, %s783_s6  ;;  %p64_p4 = scmp.eq.s32.totalorder %s677_s11, 2 }
   0x8   : > { %s846_s15 = scalar_select %p45_p1, %s791_s8, %s47_s13  }
   0x9   : > { %p848_p5 = por %p58_p2, %p57_p0  ;;  %p852_p6 = por %p64_p4, %p63_p3 }
   0xa   : > { %p680_p7 = scmp.ge.s32.totalorder %s795_s9, 1  ;;  %p92_p8 = scmp.lt.s32.totalorder %s795_s9, 4 }
   0xc   : > { %p93_p9 = pnand %p680_p7, %p92_p8 }
   0xd   : > { %s682_s18 = sshll.u32 (!%p93_p9), %s831_s10, 1  ;;  %s110_s20 = sand.u32 (!%p93_p9), 1, %s787_s7   ;;  %vm248_vm0 = vcmask (!%p93_p9), 25600  }
   0xe   : > { %96 = sbr.rel (%p93_p9) target bundleno = 138 (0x8a), region = 24  ;;  %p114_p10 = scmp.lt.s32.totalorder (!%p93_p9), %s682_s18, 5 }
   0xf   : > { %s885_s24 = sshll.u32 (!%p93_p9), %s110_s20, 5  ;;  %s691_s26 = sshll.u32 (!%p93_p9), %s831_s10, 9 }
  0x10   : > { %s919_s25 = scalar_lea.vmem (!%p93_p9), [#allocation2], %s885_s24  ;;  %s1259_s30 = scalar_lea.hbm (!%p93_p9), %s1309_s1, %s691_s26 }
  0x11   : > { %s615_s27 = sshll.u32 (!%p93_p9), %s919_s25, 4  ;;  %s1267_s2 = scalar_lea.sflag (!%p93_p9), [#allocation3], %s110_s20  ;;  %s1261_s27 = int_to_ptr.vmem [resolvable:$true] %s615_s27 }
  0x12   : > { %s733_s3 = scalar_lea.vmem (!%p93_p9), %s1261_s27, 512  ;;  %s797_s4 = smov (!%p93_p9), [#allocation2]  }
  0x13   : > { %p734_p11 = scmp.ne.s32.totalorder (!%p93_p9), %s1261_s27, %s733_s3  ;;  %s737_s5 = sshll.u32 (!%p93_p9), %s797_s4, 4  ;;  %s738_s5 = int_to_ptr.vmem [resolvable:$false] %s737_s5 }
  0x14   : > { %s739_s10 = scalar_lea.vmem (!%p93_p9), %s738_s5, 1024  ;;  %p740_p0 = scmp.lt.s32.totalorder (!%p93_p9), %s1261_s27, %s738_s5 }
  0x15   : > { %s1317_s18 = smov (!%p114_p10, %s682_s18), 5  ;;  %p735_p12 = pnand %p734_p11, %p848_p5 }
  0x16   : > { %s690_s19 = sshll.u32 %s1317_s18, 7  ;;  %p741_p1 = scmp.lt.s32.totalorder %s739_s10, %s733_s3 }
  0x17   : > { %s863_s23 = scalar_lea.vmem %s1308_s0, %s690_s19  ;;  %p736_p13 = pneg %p735_p12 }
  0x18   : > { %v120_v0 = vld [vmem:[%s863_s23] sm:$0x3]  ;;  %v121_v1 = vld [vmem:[%s863_s23 + $0x2] sm:$0x3]  ;;  %v128_v2 = vld [vmem:[%s863_s23 + $0x10] sm:$0x3]  ;;  %p742_p2 = por %p741_p1, %p740_p0 }
  0x19   : > { %v129_v3 = vld [vmem:[%s863_s23 + $0x12] sm:$0x3]  ;;  %v184_v4 = vld [vmem:[%s863_s23 + $0x80] sm:$0x3]  ;;  %v185_v5 = vld [vmem:[%s863_s23 + $0x82] sm:$0x3] }
  0x1a   : > { %v192_v6 = vld [vmem:[%s863_s23 + $0x90] sm:$0x3]  ;;  %v193_v7 = vld [vmem:[%s863_s23 + $0x92] sm:$0x3]  ;;  %v249_v8 = vsel %vm248_vm0, %v120_v0, -inf  ;;  %v250_v9 = vsel %vm248_vm0, %v184_v4, -inf  ;;  %p743_p3 = pnand %p742_p2, %p736_p13 }
  0x1b   : > { %v251_v10 = vmax.f32 %v249_v8, %v250_v9  ;;  %v252_v11 = vsel %vm248_vm0, %v121_v1, -inf  ;;  %v253_v12 = vsel %vm248_vm0, %v185_v5, -inf  ;;  %v273_v13 = vsel %vm248_vm0, %v128_v2, -inf  ;;  %v122_v14 = vld [vmem:[%s863_s23 + $0x4] sm:$0x3] }
  0x1c   : > { %v254_v15 = vmax.f32 %v252_v11, %v253_v12  ;;  %v274_v16 = vsel %vm248_vm0, %v192_v6, -inf  ;;  %v276_v17 = vsel %vm248_vm0, %v129_v3, -inf  ;;  %v277_v18 = vsel %vm248_vm0, %v193_v7, -inf  ;;  %v123_v19 = vld [vmem:[%s863_s23 + $0x6] sm:$0x3] }
  0x1d   : > { %v275_v20 = vmax.f32 %v273_v13, %v274_v16  ;;  %v278_v21 = vmax.f32 %v276_v17, %v277_v18  ;;  %v441_v22 = vsel %vm248_vm0, %v251_v10, -inf  ;;  %v130_v23 = vld [vmem:[%s863_s23 + $0x14] sm:$0x3]  ;;  %v255_v24 = vsel %vm248_vm0, %v122_v14, -inf  ;;  %v186_v26 = vld [vmem:[%s863_s23 + $0x84] sm:$0x3] }
  0x1e   : > { %v444_v25 = vsel %vm248_vm0, %v254_v15, -inf  ;;  %v187_v27 = vld [vmem:[%s863_s23 + $0x86] sm:$0x3]  ;;  %v258_v28 = vsel %vm248_vm0, %v123_v19, -inf  ;;  %v131_v31 = vld [vmem:[%s863_s23 + $0x16] sm:$0x3] }
  0x1f   : > { %v442_v29 = vsel %vm248_vm0, %v275_v20, -inf  ;;  %v445_v30 = vsel %vm248_vm0, %v278_v21, -inf  ;;  %v194_v32 = vld [vmem:[%s863_s23 + $0x94] sm:$0x3]  ;;  %v195_v35 = vld [vmem:[%s863_s23 + $0x96] sm:$0x3] }
  0x20   : > { %v443_v33 = vmax.f32 %v441_v22, %v442_v29  ;;  %v446_v34 = vmax.f32 %v444_v25, %v445_v30  ;;  %v256_v36 = vsel %vm248_vm0, %v186_v26, -inf  ;;  %v259_v37 = vsel %vm248_vm0, %v187_v27, -inf  ;;  %v124_v38 = vld [vmem:[%s863_s23 + $0x8] sm:$0x3]  ;;  %v125_v43 = vld [vmem:[%s863_s23 + $0xa] sm:$0x3] }
  0x21   : > { %v257_v39 = vmax.f32 %v255_v24, %v256_v36  ;;  %v260_v40 = vmax.f32 %v258_v28, %v259_v37  ;;  %v279_v41 = vsel %vm248_vm0, %v130_v23, -inf  ;;  %v280_v42 = vsel %vm248_vm0, %v194_v32, -inf  ;;  %v132_v44 = vld [vmem:[%s863_s23 + $0x18] sm:$0x3]  ;;  %v188_v49 = vld [vmem:[%s863_s23 + $0x88] sm:$0x3] }
  0x22   : > { %v537_v45 = vsel %vm248_vm0, %v443_v33, -inf  ;;  %v538_v46 = vsel %vm248_vm0, %v446_v34, -inf  ;;  %v281_v47 = vmax.f32 %v279_v41, %v280_v42  ;;  %v282_v48 = vsel %vm248_vm0, %v131_v31, -inf  ;;  %v133_v53 = vld [vmem:[%s863_s23 + $0x1a] sm:$0x3] }
  0x23   : > { %v539_v50 = vmax.f32 %v537_v45, %v538_v46  ;;  %v283_v51 = vsel %vm248_vm0, %v195_v35, -inf  ;;  %v447_v52 = vsel %vm248_vm0, %v257_v39, -inf  ;;  %v189_v54 = vld [vmem:[%s863_s23 + $0x8a] sm:$0x3]  ;;  %v450_v57 = vsel %vm248_vm0, %v260_v40, -inf }
  0x24   : > { %v284_v55 = vmax.f32 %v282_v48, %v283_v51  ;;  %v448_v56 = vsel %vm248_vm0, %v281_v47, -inf  ;;  %v196_v58 = vld [vmem:[%s863_s23 + $0x98] sm:$0x3]  ;;  %v261_v59 = vsel %vm248_vm0, %v124_v38, -inf  ;;  %v197_v61 = vld [vmem:[%s863_s23 + $0x9a] sm:$0x3] }
  0x25   : > { %585 = vst.msk [vmem:[%s919_s25] sm:$0x3] %vm248_vm0, %v539_v50  ;;  %v449_v60 = vmax.f32 %v447_v52, %v448_v56  ;;  %v262_v62 = vsel %vm248_vm0, %v188_v49, -inf  ;;  %v264_v63 = vsel %vm248_vm0, %v125_v43, -inf  ;;  %v265_v0 = vsel %vm248_vm0, %v189_v54, -inf }
  0x26   : > { %v451_v1 = vsel %vm248_vm0, %v284_v55, -inf  ;;  %v263_v2 = vmax.f32 %v261_v59, %v262_v62  ;;  %v266_v3 = vmax.f32 %v264_v63, %v265_v0  ;;  %v285_v4 = vsel %vm248_vm0, %v132_v44, -inf  ;;  %v126_v5 = vld [vmem:[%s863_s23 + $0xc] sm:$0x3]  ;;  %v127_v6 = vld [vmem:[%s863_s23 + $0xe] sm:$0x3] }
  0x27   : > { %v452_v7 = vmax.f32 %v450_v57, %v451_v1  ;;  %v540_v8 = vsel %vm248_vm0, %v449_v60, -inf  ;;  %v286_v9 = vsel %vm248_vm0, %v196_v58, -inf  ;;  %v288_v10 = vsel %vm248_vm0, %v133_v53, -inf  ;;  %v134_v11 = vld [vmem:[%s863_s23 + $0x1c] sm:$0x3] }
  0x28   : > { %v287_v12 = vmax.f32 %v285_v4, %v286_v9  ;;  %v289_v13 = vsel %vm248_vm0, %v197_v61, -inf  ;;  %v453_v14 = vsel %vm248_vm0, %v263_v2, -inf  ;;  %v456_v15 = vsel %vm248_vm0, %v266_v3, -inf  ;;  %v135_v16 = vld [vmem:[%s863_s23 + $0x1e] sm:$0x3] }
  0x29   : > { %v190_v17 = vld [vmem:[%s863_s23 + $0x8c] sm:$0x3]  ;;  %v541_v18 = vsel %vm248_vm0, %v452_v7, -inf  ;;  %v290_v19 = vmax.f32 %v288_v10, %v289_v13  ;;  %v191_v20 = vld [vmem:[%s863_s23 + $0x8e] sm:$0x3]  ;;  %v267_v22 = vsel %vm248_vm0, %v126_v5, -inf }
  0x2a   : > { %v198_v21 = vld [vmem:[%s863_s23 + $0x9c] sm:$0x3]  ;;  %v542_v23 = vmax.f32 %v540_v8, %v541_v18  ;;  %v454_v24 = vsel %vm248_vm0, %v287_v12, -inf  ;;  %v199_v25 = vld [vmem:[%s863_s23 + $0x9e] sm:$0x3]  ;;  %v268_v26 = vsel %vm248_vm0, %v190_v17, -inf }
  0x2b   : > { %v270_v27 = vsel %vm248_vm0, %v127_v6, -inf  ;;  %v455_v28 = vmax.f32 %v453_v14, %v454_v24  ;;  %v457_v29 = vsel %vm248_vm0, %v290_v19, -inf  ;;  %v269_v30 = vmax.f32 %v267_v22, %v268_v26  ;;  %v136_v32 = vld [vmem:[%s863_s23 + $0x20] sm:$0x3]  ;;  %v137_v37 = vld [vmem:[%s863_s23 + $0x22] sm:$0x3] }
  0x2c   : > { %v271_v31 = vsel %vm248_vm0, %v191_v20, -inf  ;;  %586 = vst.msk [vmem:[%s919_s25 + $0x2] sm:$0x3] %vm248_vm0, %v542_v23  ;;  %v458_v33 = vmax.f32 %v456_v15, %v457_v29  ;;  %v291_v35 = vsel %vm248_vm0, %v134_v11, -inf  ;;  %v292_v36 = vsel %vm248_vm0, %v198_v21, -inf }
  0x2d   : > { %v272_v34 = vmax.f32 %v270_v27, %v271_v31  ;;  %v144_v38 = vld [vmem:[%s863_s23 + $0x30] sm:$0x3]  ;;  %v543_v39 = vsel %vm248_vm0, %v455_v28, -inf  ;;  %v293_v40 = vmax.f32 %v291_v35, %v292_v36  ;;  %v294_v41 = vsel %vm248_vm0, %v135_v16, -inf  ;;  %v200_v43 = vld [vmem:[%s863_s23 + $0xa0] sm:$0x3] }
  0x2e   : > { %v295_v42 = vsel %vm248_vm0, %v199_v25, -inf  ;;  %v544_v44 = vsel %vm248_vm0, %v458_v33, -inf  ;;  %v459_v46 = vsel %vm248_vm0, %v269_v30, -inf  ;;  %v201_v48 = vld [vmem:[%s863_s23 + $0xa2] sm:$0x3]  ;;  %v297_v53 = vsel %vm248_vm0, %v136_v32, -inf }
  0x2f   : > { %v296_v45 = vmax.f32 %v294_v41, %v295_v42  ;;  %v462_v47 = vsel %vm248_vm0, %v272_v34, -inf  ;;  %v545_v49 = vmax.f32 %v543_v39, %v544_v44  ;;  %v460_v50 = vsel %vm248_vm0, %v293_v40, -inf  ;;  %v145_v51 = vld [vmem:[%s863_s23 + $0x32] sm:$0x3]  ;;  %v208_v52 = vld [vmem:[%s863_s23 + $0xb0] sm:$0x3] }
  0x30   : > { %v461_v54 = vmax.f32 %v459_v46, %v460_v50  ;;  %v209_v56 = vld [vmem:[%s863_s23 + $0xb2] sm:$0x3]  ;;  %v298_v57 = vsel %vm248_vm0, %v200_v43, -inf  ;;  %v300_v58 = vsel %vm248_vm0, %v137_v37, -inf  ;;  %v301_v61 = vsel %vm248_vm0, %v201_v48, -inf }
  0x31   : > { %v463_v55 = vsel %vm248_vm0, %v296_v45, -inf  ;;  %587 = vst.msk [vmem:[%s919_s25 + $0x4] sm:$0x3] %vm248_vm0, %v545_v49  ;;  %v299_v60 = vmax.f32 %v297_v53, %v298_v57  ;;  %v321_v62 = vsel %vm248_vm0, %v144_v38, -inf  ;;  %v138_v63 = vld [vmem:[%s863_s23 + $0x24] sm:$0x3]  ;;  %v302_v2 = vmax.f32 %v300_v58, %v301_v61 }
  0x32   : > { %v464_v59 = vmax.f32 %v462_v47, %v463_v55  ;;  %v139_v0 = vld [vmem:[%s863_s23 + $0x26] sm:$0x3]  ;;  %v546_v1 = vsel %vm248_vm0, %v461_v54, -inf  ;;  %v322_v3 = vsel %vm248_vm0, %v208_v52, -inf  ;;  %v324_v4 = vsel %vm248_vm0, %v145_v51, -inf }
  0x33   : > { %v146_v5 = vld [vmem:[%s863_s23 + $0x34] sm:$0x3]  ;;  %v147_v6 = vld [vmem:[%s863_s23 + $0x36] sm:$0x3]  ;;  %v323_v8 = vmax.f32 %v321_v62, %v322_v3  ;;  %v325_v9 = vsel %vm248_vm0, %v209_v56, -inf  ;;  %v465_v10 = vsel %vm248_vm0, %v299_v60, -inf }
  0x34   : > { %v547_v7 = vsel %vm248_vm0, %v464_v59, -inf  ;;  %v202_v11 = vld [vmem:[%s863_s23 + $0xa4] sm:$0x3]  ;;  %v326_v13 = vmax.f32 %v324_v4, %v325_v9  ;;  %v468_v14 = vsel %vm248_vm0, %v302_v2, -inf  ;;  %v203_v15 = vld [vmem:[%s863_s23 + $0xa6] sm:$0x3] }
  0x35   : > { %v548_v12 = vmax.f32 %v546_v1, %v547_v7  ;;  %v210_v16 = vld [vmem:[%s863_s23 + $0xb4] sm:$0x3]  ;;  %v303_v17 = vsel %vm248_vm0, %v138_v63, -inf  ;;  %v466_v18 = vsel %vm248_vm0, %v323_v8, -inf  ;;  %v211_v19 = vld [vmem:[%s863_s23 + $0xb6] sm:$0x3] }
  0x36   : > { %v304_v20 = vsel %vm248_vm0, %v202_v11, -inf  ;;  %v306_v21 = vsel %vm248_vm0, %v139_v0, -inf  ;;  %v307_v22 = vsel %vm248_vm0, %v203_v15, -inf  ;;  %v467_v23 = vmax.f32 %v465_v10, %v466_v18  ;;  %v140_v27 = vld [vmem:[%s863_s23 + $0x28] sm:$0x3] }
  0x37   : > { %588 = vst.msk [vmem:[%s919_s25 + $0x6] sm:$0x3] %vm248_vm0, %v548_v12  ;;  %v469_v24 = vsel %vm248_vm0, %v326_v13, -inf  ;;  %v305_v25 = vmax.f32 %v303_v17, %v304_v20  ;;  %v308_v26 = vmax.f32 %v306_v21, %v307_v22  ;;  %v327_v29 = vsel %vm248_vm0, %v146_v5, -inf  ;;  %v141_v32 = vld [vmem:[%s863_s23 + $0x2a] sm:$0x3] }
  0x38   : > { %v470_v28 = vmax.f32 %v468_v14, %v469_v24  ;;  %v328_v30 = vsel %vm248_vm0, %v210_v16, -inf  ;;  %v330_v31 = vsel %vm248_vm0, %v147_v6, -inf  ;;  %v549_v33 = vsel %vm248_vm0, %v467_v23, -inf  ;;  %v148_v37 = vld [vmem:[%s863_s23 + $0x38] sm:$0x3] }
  0x39   : > { %v329_v34 = vmax.f32 %v327_v29, %v328_v30  ;;  %v331_v35 = vsel %vm248_vm0, %v211_v19, -inf  ;;  %v471_v36 = vsel %vm248_vm0, %v305_v25, -inf  ;;  %v474_v40 = vsel %vm248_vm0, %v308_v26, -inf  ;;  %v204_v41 = vld [vmem:[%s863_s23 + $0xa8] sm:$0x3] }
  0x3a   : > { %v550_v38 = vsel %vm248_vm0, %v470_v28, -inf  ;;  %v332_v39 = vmax.f32 %v330_v31, %v331_v35  ;;  %v205_v42 = vld [vmem:[%s863_s23 + $0xaa] sm:$0x3]  ;;  %v149_v45 = vld [vmem:[%s863_s23 + $0x3a] sm:$0x3]  ;;  %v309_v47 = vsel %vm248_vm0, %v140_v27, -inf }
  0x3b   : > { %v551_v43 = vmax.f32 %v549_v33, %v550_v38  ;;  %v472_v44 = vsel %vm248_vm0, %v329_v34, -inf  ;;  %v212_v46 = vld [vmem:[%s863_s23 + $0xb8] sm:$0x3]  ;;  %v213_v50 = vld [vmem:[%s863_s23 + $0xba] sm:$0x3]  ;;  %v310_v51 = vsel %vm248_vm0, %v204_v41, -inf }
  0x3c   : > { %v473_v48 = vmax.f32 %v471_v36, %v472_v44  ;;  %v475_v49 = vsel %vm248_vm0, %v332_v39, -inf  ;;  %v312_v52 = vsel %vm248_vm0, %v141_v32, -inf  ;;  %v311_v54 = vmax.f32 %v309_v47, %v310_v51  ;;  %v142_v57 = vld [vmem:[%s863_s23 + $0x2c] sm:$0x3]  ;;  %v143_v58 = vld [vmem:[%s863_s23 + $0x2e] sm:$0x3] }
  0x3d   : > { %589 = vst.msk [vmem:[%s919_s25 + $0x8] sm:$0x3] %vm248_vm0, %v551_v43  ;;  %v476_v53 = vmax.f32 %v474_v40, %v475_v49  ;;  %v313_v55 = vsel %vm248_vm0, %v205_v42, -inf  ;;  %v333_v56 = vsel %vm248_vm0, %v148_v37, -inf  ;;  %v334_v61 = vsel %vm248_vm0, %v212_v46, -inf }
  0x3e   : > { %v552_v59 = vsel %vm248_vm0, %v473_v48, -inf  ;;  %v314_v60 = vmax.f32 %v312_v52, %v313_v55  ;;  %v336_v62 = vsel %vm248_vm0, %v149_v45, -inf  ;;  %v150_v63 = vld [vmem:[%s863_s23 + $0x3c] sm:$0x3]  ;;  %v151_v0 = vld [vmem:[%s863_s23 + $0x3e] sm:$0x3]  ;;  %v335_v2 = vmax.f32 %v333_v56, %v334_v61 }
  0x3f   : > { %v553_v1 = vsel %vm248_vm0, %v476_v53, -inf  ;;  %v337_v3 = vsel %vm248_vm0, %v213_v50, -inf  ;;  %v477_v4 = vsel %vm248_vm0, %v311_v54, -inf  ;;  %v206_v5 = vld [vmem:[%s863_s23 + $0xac] sm:$0x3]  ;;  %v315_v11 = vsel %vm248_vm0, %v142_v57, -inf }
  0x40   : > { %v554_v6 = vmax.f32 %v552_v59, %v553_v1  ;;  %v338_v7 = vmax.f32 %v336_v62, %v337_v3  ;;  %v480_v8 = vsel %vm248_vm0, %v314_v60, -inf  ;;  %v207_v9 = vld [vmem:[%s863_s23 + $0xae] sm:$0x3]  ;;  %v214_v10 = vld [vmem:[%s863_s23 + $0xbc] sm:$0x3]  ;;  %v478_v12 = vsel %vm248_vm0, %v335_v2, -inf }
  0x41   : > { %v215_v13 = vld [vmem:[%s863_s23 + $0xbe] sm:$0x3]  ;;  %v316_v14 = vsel %vm248_vm0, %v206_v5, -inf  ;;  %v318_v15 = vsel %vm248_vm0, %v143_v58, -inf  ;;  %v319_v16 = vsel %vm248_vm0, %v207_v9, -inf  ;;  %v479_v17 = vmax.f32 %v477_v4, %v478_v12 }
  0x42   : > { %590 = vst.msk [vmem:[%s919_s25 + $0xa] sm:$0x3] %vm248_vm0, %v554_v6  ;;  %v481_v18 = vsel %vm248_vm0, %v338_v7, -inf  ;;  %v317_v19 = vmax.f32 %v315_v11, %v316_v14  ;;  %v320_v20 = vmax.f32 %v318_v15, %v319_v16  ;;  %v152_v21 = vld [vmem:[%s863_s23 + $0x40] sm:$0x3]  ;;  %v339_v23 = vsel %vm248_vm0, %v150_v63, -inf }
  0x43   : > { %v482_v22 = vmax.f32 %v480_v8, %v481_v18  ;;  %v340_v24 = vsel %vm248_vm0, %v214_v10, -inf  ;;  %v342_v25 = vsel %vm248_vm0, %v151_v0, -inf  ;;  %v153_v26 = vld [vmem:[%s863_s23 + $0x42] sm:$0x3]  ;;  %v555_v27 = vsel %vm248_vm0, %v479_v17, -inf }
  0x44   : > { %v341_v28 = vmax.f32 %v339_v23, %v340_v24  ;;  %v343_v29 = vsel %vm248_vm0, %v215_v13, -inf  ;;  %v483_v30 = vsel %vm248_vm0, %v317_v19, -inf  ;;  %v160_v31 = vld [vmem:[%s863_s23 + $0x50] sm:$0x3]  ;;  %v486_v34 = vsel %vm248_vm0, %v320_v20, -inf }
  0x45   : > { %v556_v32 = vsel %vm248_vm0, %v482_v22, -inf  ;;  %v344_v33 = vmax.f32 %v342_v25, %v343_v29  ;;  %v216_v35 = vld [vmem:[%s863_s23 + $0xc0] sm:$0x3]  ;;  %v217_v36 = vld [vmem:[%s863_s23 + $0xc2] sm:$0x3]  ;;  %v345_v41 = vsel %vm248_vm0, %v152_v21, -inf }
  0x46   : > { %v557_v37 = vmax.f32 %v555_v27, %v556_v32  ;;  %v484_v38 = vsel %vm248_vm0, %v341_v28, -inf  ;;  %v161_v39 = vld [vmem:[%s863_s23 + $0x52] sm:$0x3]  ;;  %v224_v40 = vld [vmem:[%s863_s23 + $0xd0] sm:$0x3]  ;;  %v346_v45 = vsel %vm248_vm0, %v216_v35, -inf }
  0x47   : > { %v485_v42 = vmax.f32 %v483_v30, %v484_v38  ;;  %v487_v43 = vsel %vm248_vm0, %v344_v33, -inf  ;;  %v225_v44 = vld [vmem:[%s863_s23 + $0xd2] sm:$0x3]  ;;  %v348_v46 = vsel %vm248_vm0, %v153_v26, -inf  ;;  %v347_v48 = vmax.f32 %v345_v41, %v346_v45  ;;  %v154_v51 = vld [vmem:[%s863_s23 + $0x44] sm:$0x3] }
  0x48   : > { %591 = vst.msk [vmem:[%s919_s25 + $0xc] sm:$0x3] %vm248_vm0, %v557_v37  ;;  %v488_v47 = vmax.f32 %v486_v34, %v487_v43  ;;  %v349_v49 = vsel %vm248_vm0, %v217_v36, -inf  ;;  %v369_v50 = vsel %vm248_vm0, %v160_v31, -inf  ;;  %v155_v52 = vld [vmem:[%s863_s23 + $0x46] sm:$0x3] }
  0x49   : > { %v558_v53 = vsel %vm248_vm0, %v485_v42, -inf  ;;  %v350_v54 = vmax.f32 %v348_v46, %v349_v49  ;;  %v370_v55 = vsel %vm248_vm0, %v224_v40, -inf  ;;  %v372_v56 = vsel %vm248_vm0, %v161_v39, -inf  ;;  %v162_v57 = vld [vmem:[%s863_s23 + $0x54] sm:$0x3] }
  0x4a   : > { %v163_v58 = vld [vmem:[%s863_s23 + $0x56] sm:$0x3]  ;;  %v559_v59 = vsel %vm248_vm0, %v488_v47, -inf  ;;  %v371_v60 = vmax.f32 %v369_v50, %v370_v55  ;;  %v373_v61 = vsel %vm248_vm0, %v225_v44, -inf  ;;  %v489_v62 = vsel %vm248_vm0, %v347_v48, -inf }
  0x4b   : > { %v218_v63 = vld [vmem:[%s863_s23 + $0xc4] sm:$0x3]  ;;  %v560_v0 = vmax.f32 %v558_v53, %v559_v59  ;;  %v374_v1 = vmax.f32 %v372_v56, %v373_v61  ;;  %v492_v2 = vsel %vm248_vm0, %v350_v54, -inf  ;;  %v219_v3 = vld [vmem:[%s863_s23 + $0xc6] sm:$0x3]  ;;  %v351_v5 = vsel %vm248_vm0, %v154_v51, -inf }
  0x4c   : > { %v226_v4 = vld [vmem:[%s863_s23 + $0xd4] sm:$0x3]  ;;  %v490_v6 = vsel %vm248_vm0, %v371_v60, -inf  ;;  %v227_v7 = vld [vmem:[%s863_s23 + $0xd6] sm:$0x3]  ;;  %v352_v8 = vsel %vm248_vm0, %v218_v63, -inf }
  0x4d   : > { %v354_v9 = vsel %vm248_vm0, %v155_v52, -inf  ;;  %v355_v10 = vsel %vm248_vm0, %v219_v3, -inf  ;;  %592 = vst.msk [vmem:[%s919_s25 + $0xe] sm:$0x3] %vm248_vm0, %v560_v0  ;;  %v491_v11 = vmax.f32 %v489_v62, %v490_v6  ;;  %v493_v12 = vsel %vm248_vm0, %v374_v1, -inf }
  0x4e   : > { %v353_v13 = vmax.f32 %v351_v5, %v352_v8  ;;  %v356_v14 = vmax.f32 %v354_v9, %v355_v10  ;;  %v156_v15 = vld [vmem:[%s863_s23 + $0x48] sm:$0x3]  ;;  %v494_v16 = vmax.f32 %v492_v2, %v493_v12  ;;  %v375_v17 = vsel %vm248_vm0, %v162_v57, -inf  ;;  %v157_v20 = vld [vmem:[%s863_s23 + $0x4a] sm:$0x3] }
  0x4f   : > { %v376_v18 = vsel %vm248_vm0, %v226_v4, -inf  ;;  %v378_v19 = vsel %vm248_vm0, %v163_v58, -inf  ;;  %v561_v21 = vsel %vm248_vm0, %v491_v11, -inf  ;;  %v379_v23 = vsel %vm248_vm0, %v227_v7, -inf  ;;  %v164_v25 = vld [vmem:[%s863_s23 + $0x58] sm:$0x3] }
  0x50   : > { %v377_v22 = vmax.f32 %v375_v17, %v376_v18  ;;  %v495_v24 = vsel %vm248_vm0, %v353_v13, -inf  ;;  %v562_v26 = vsel %vm248_vm0, %v494_v16, -inf  ;;  %v380_v27 = vmax.f32 %v378_v19, %v379_v23  ;;  %v220_v29 = vld [vmem:[%s863_s23 + $0xc8] sm:$0x3]  ;;  %v221_v30 = vld [vmem:[%s863_s23 + $0xca] sm:$0x3] }
  0x51   : > { %v498_v28 = vsel %vm248_vm0, %v356_v14, -inf  ;;  %v563_v31 = vmax.f32 %v561_v21, %v562_v26  ;;  %v165_v33 = vld [vmem:[%s863_s23 + $0x5a] sm:$0x3]  ;;  %v228_v34 = vld [vmem:[%s863_s23 + $0xd8] sm:$0x3]  ;;  %v357_v35 = vsel %vm248_vm0, %v156_v15, -inf }
  0x52   : > { %v496_v32 = vsel %vm248_vm0, %v377_v22, -inf  ;;  %v499_v37 = vsel %vm248_vm0, %v380_v27, -inf  ;;  %v229_v38 = vld [vmem:[%s863_s23 + $0xda] sm:$0x3]  ;;  %v358_v39 = vsel %vm248_vm0, %v220_v29, -inf  ;;  %v360_v40 = vsel %vm248_vm0, %v157_v20, -inf }
  0x53   : > { %v497_v36 = vmax.f32 %v495_v24, %v496_v32  ;;  %593 = vst.msk [vmem:[%s919_s25 + $0x10] sm:$0x3] %vm248_vm0, %v563_v31  ;;  %v500_v41 = vmax.f32 %v498_v28, %v499_v37  ;;  %v359_v42 = vmax.f32 %v357_v35, %v358_v39  ;;  %v361_v43 = vsel %vm248_vm0, %v221_v30, -inf  ;;  %v158_v45 = vld [vmem:[%s863_s23 + $0x4c] sm:$0x3] }
  0x54   : > { %v381_v44 = vsel %vm248_vm0, %v164_v25, -inf  ;;  %v159_v46 = vld [vmem:[%s863_s23 + $0x4e] sm:$0x3]  ;;  %v362_v48 = vmax.f32 %v360_v40, %v361_v43  ;;  %v382_v49 = vsel %vm248_vm0, %v228_v34, -inf  ;;  %v384_v50 = vsel %vm248_vm0, %v165_v33, -inf }
  0x55   : > { %v564_v47 = vsel %vm248_vm0, %v497_v36, -inf  ;;  %v166_v51 = vld [vmem:[%s863_s23 + $0x5c] sm:$0x3]  ;;  %v167_v52 = vld [vmem:[%s863_s23 + $0x5e] sm:$0x3]  ;;  %v565_v53 = vsel %vm248_vm0, %v500_v41, -inf  ;;  %v383_v54 = vmax.f32 %v381_v44, %v382_v49 }
  0x56   : > { %v385_v55 = vsel %vm248_vm0, %v229_v38, -inf  ;;  %v501_v56 = vsel %vm248_vm0, %v359_v42, -inf  ;;  %v222_v57 = vld [vmem:[%s863_s23 + $0xcc] sm:$0x3]  ;;  %v566_v58 = vmax.f32 %v564_v47, %v565_v53  ;;  %v504_v60 = vsel %vm248_vm0, %v362_v48, -inf }
  0x57   : > { %v386_v59 = vmax.f32 %v384_v50, %v385_v55  ;;  %v223_v61 = vld [vmem:[%s863_s23 + $0xce] sm:$0x3]  ;;  %v230_v62 = vld [vmem:[%s863_s23 + $0xdc] sm:$0x3]  ;;  %v363_v63 = vsel %vm248_vm0, %v158_v45, -inf  ;;  %v502_v0 = vsel %vm248_vm0, %v383_v54, -inf }
  0x58   : > { %v231_v1 = vld [vmem:[%s863_s23 + $0xde] sm:$0x3]  ;;  %v364_v2 = vsel %vm248_vm0, %v222_v57, -inf  ;;  %v366_v3 = vsel %vm248_vm0, %v159_v46, -inf  ;;  %v367_v4 = vsel %vm248_vm0, %v223_v61, -inf  ;;  %v503_v5 = vmax.f32 %v501_v56, %v502_v0 }
  0x59   : > { %594 = vst.msk [vmem:[%s919_s25 + $0x12] sm:$0x3] %vm248_vm0, %v566_v58  ;;  %v505_v6 = vsel %vm248_vm0, %v386_v59, -inf  ;;  %v365_v7 = vmax.f32 %v363_v63, %v364_v2  ;;  %v368_v8 = vmax.f32 %v366_v3, %v367_v4  ;;  %v168_v9 = vld [vmem:[%s863_s23 + $0x60] sm:$0x3]  ;;  %v387_v11 = vsel %vm248_vm0, %v166_v51, -inf }
  0x5a   : > { %v506_v10 = vmax.f32 %v504_v60, %v505_v6  ;;  %v388_v12 = vsel %vm248_vm0, %v230_v62, -inf  ;;  %v390_v13 = vsel %vm248_vm0, %v167_v52, -inf  ;;  %v169_v14 = vld [vmem:[%s863_s23 + $0x62] sm:$0x3]  ;;  %v567_v15 = vsel %vm248_vm0, %v503_v5, -inf }
  0x5b   : > { %v389_v16 = vmax.f32 %v387_v11, %v388_v12  ;;  %v391_v17 = vsel %vm248_vm0, %v231_v1, -inf  ;;  %v507_v18 = vsel %vm248_vm0, %v365_v7, -inf  ;;  %v176_v19 = vld [vmem:[%s863_s23 + $0x70] sm:$0x3]  ;;  %v510_v22 = vsel %vm248_vm0, %v368_v8, -inf }
  0x5c   : > { %v568_v20 = vsel %vm248_vm0, %v506_v10, -inf  ;;  %v392_v21 = vmax.f32 %v390_v13, %v391_v17  ;;  %v232_v23 = vld [vmem:[%s863_s23 + $0xe0] sm:$0x3]  ;;  %v233_v24 = vld [vmem:[%s863_s23 + $0xe2] sm:$0x3]  ;;  %v393_v29 = vsel %vm248_vm0, %v168_v9, -inf }
  0x5d   : > { %v569_v25 = vmax.f32 %v567_v15, %v568_v20  ;;  %v508_v26 = vsel %vm248_vm0, %v389_v16, -inf  ;;  %v177_v27 = vld [vmem:[%s863_s23 + $0x72] sm:$0x3]  ;;  %v240_v28 = vld [vmem:[%s863_s23 + $0xf0] sm:$0x3]  ;;  %v394_v33 = vsel %vm248_vm0, %v232_v23, -inf }
  0x5e   : > { %v509_v30 = vmax.f32 %v507_v18, %v508_v26  ;;  %v511_v31 = vsel %vm248_vm0, %v392_v21, -inf  ;;  %v241_v32 = vld [vmem:[%s863_s23 + $0xf2] sm:$0x3]  ;;  %v396_v34 = vsel %vm248_vm0, %v169_v14, -inf  ;;  %v395_v36 = vmax.f32 %v393_v29, %v394_v33  ;;  %v170_v39 = vld [vmem:[%s863_s23 + $0x64] sm:$0x3] }
  0x5f   : > { %595 = vst.msk [vmem:[%s919_s25 + $0x14] sm:$0x3] %vm248_vm0, %v569_v25  ;;  %v512_v35 = vmax.f32 %v510_v22, %v511_v31  ;;  %v397_v37 = vsel %vm248_vm0, %v233_v24, -inf  ;;  %v417_v38 = vsel %vm248_vm0, %v176_v19, -inf  ;;  %v171_v40 = vld [vmem:[%s863_s23 + $0x66] sm:$0x3] }
  0x60   : > { %v570_v41 = vsel %vm248_vm0, %v509_v30, -inf  ;;  %v398_v42 = vmax.f32 %v396_v34, %v397_v37  ;;  %v418_v43 = vsel %vm248_vm0, %v240_v28, -inf  ;;  %v420_v44 = vsel %vm248_vm0, %v177_v27, -inf  ;;  %v178_v45 = vld [vmem:[%s863_s23 + $0x74] sm:$0x3] }
  0x61   : > { %v179_v46 = vld [vmem:[%s863_s23 + $0x76] sm:$0x3]  ;;  %v571_v47 = vsel %vm248_vm0, %v512_v35, -inf  ;;  %v419_v48 = vmax.f32 %v417_v38, %v418_v43  ;;  %v421_v49 = vsel %vm248_vm0, %v241_v32, -inf  ;;  %v513_v50 = vsel %vm248_vm0, %v395_v36, -inf }
  0x62   : > { %v234_v51 = vld [vmem:[%s863_s23 + $0xe4] sm:$0x3]  ;;  %v572_v52 = vmax.f32 %v570_v41, %v571_v47  ;;  %v422_v53 = vmax.f32 %v420_v44, %v421_v49  ;;  %v516_v54 = vsel %vm248_vm0, %v398_v42, -inf  ;;  %v235_v55 = vld [vmem:[%s863_s23 + $0xe6] sm:$0x3]  ;;  %v399_v57 = vsel %vm248_vm0, %v170_v39, -inf }
  0x63   : > { %v242_v56 = vld [vmem:[%s863_s23 + $0xf4] sm:$0x3]  ;;  %v514_v58 = vsel %vm248_vm0, %v419_v48, -inf  ;;  %v243_v59 = vld [vmem:[%s863_s23 + $0xf6] sm:$0x3]  ;;  %v400_v60 = vsel %vm248_vm0, %v234_v51, -inf }
  0x64   : > { %v402_v61 = vsel %vm248_vm0, %v171_v40, -inf  ;;  %v403_v62 = vsel %vm248_vm0, %v235_v55, -inf  ;;  %596 = vst.msk [vmem:[%s919_s25 + $0x16] sm:$0x3] %vm248_vm0, %v572_v52  ;;  %v515_v63 = vmax.f32 %v513_v50, %v514_v58  ;;  %v517_v0 = vsel %vm248_vm0, %v422_v53, -inf }
  0x65   : > { %v401_v1 = vmax.f32 %v399_v57, %v400_v60  ;;  %v404_v2 = vmax.f32 %v402_v61, %v403_v62  ;;  %v172_v3 = vld [vmem:[%s863_s23 + $0x68] sm:$0x3]  ;;  %v518_v4 = vmax.f32 %v516_v54, %v517_v0  ;;  %v423_v5 = vsel %vm248_vm0, %v178_v45, -inf  ;;  %v173_v8 = vld [vmem:[%s863_s23 + $0x6a] sm:$0x3] }
  0x66   : > { %v424_v6 = vsel %vm248_vm0, %v242_v56, -inf  ;;  %v426_v7 = vsel %vm248_vm0, %v179_v46, -inf  ;;  %v573_v9 = vsel %vm248_vm0, %v515_v63, -inf  ;;  %v427_v11 = vsel %vm248_vm0, %v243_v59, -inf  ;;  %v180_v13 = vld [vmem:[%s863_s23 + $0x78] sm:$0x3] }
  0x67   : > { %v425_v10 = vmax.f32 %v423_v5, %v424_v6  ;;  %v519_v12 = vsel %vm248_vm0, %v401_v1, -inf  ;;  %v574_v14 = vsel %vm248_vm0, %v518_v4, -inf  ;;  %v428_v15 = vmax.f32 %v426_v7, %v427_v11  ;;  %v236_v17 = vld [vmem:[%s863_s23 + $0xe8] sm:$0x3]  ;;  %v237_v18 = vld [vmem:[%s863_s23 + $0xea] sm:$0x3] }
  0x68   : > { %v522_v16 = vsel %vm248_vm0, %v404_v2, -inf  ;;  %v575_v19 = vmax.f32 %v573_v9, %v574_v14  ;;  %v181_v21 = vld [vmem:[%s863_s23 + $0x7a] sm:$0x3]  ;;  %v244_v22 = vld [vmem:[%s863_s23 + $0xf8] sm:$0x3]  ;;  %v405_v23 = vsel %vm248_vm0, %v172_v3, -inf }
  0x69   : > { %v520_v20 = vsel %vm248_vm0, %v425_v10, -inf  ;;  %v523_v25 = vsel %vm248_vm0, %v428_v15, -inf  ;;  %v245_v26 = vld [vmem:[%s863_s23 + $0xfa] sm:$0x3]  ;;  %v406_v27 = vsel %vm248_vm0, %v236_v17, -inf  ;;  %v408_v28 = vsel %vm248_vm0, %v173_v8, -inf }
  0x6a   : > { %v521_v24 = vmax.f32 %v519_v12, %v520_v20  ;;  %597 = vst.msk [vmem:[%s919_s25 + $0x18] sm:$0x3] %vm248_vm0, %v575_v19  ;;  %v524_v29 = vmax.f32 %v522_v16, %v523_v25  ;;  %v407_v30 = vmax.f32 %v405_v23, %v406_v27  ;;  %v409_v31 = vsel %vm248_vm0, %v237_v18, -inf  ;;  %v174_v33 = vld [vmem:[%s863_s23 + $0x6c] sm:$0x3] }
  0x6b   : > { %v429_v32 = vsel %vm248_vm0, %v180_v13, -inf  ;;  %v175_v34 = vld [vmem:[%s863_s23 + $0x6e] sm:$0x3]  ;;  %v410_v36 = vmax.f32 %v408_v28, %v409_v31  ;;  %v430_v37 = vsel %vm248_vm0, %v244_v22, -inf  ;;  %v432_v38 = vsel %vm248_vm0, %v181_v21, -inf }
  0x6c   : > { %v576_v35 = vsel %vm248_vm0, %v521_v24, -inf  ;;  %v182_v39 = vld [vmem:[%s863_s23 + $0x7c] sm:$0x3]  ;;  %v183_v40 = vld [vmem:[%s863_s23 + $0x7e] sm:$0x3]  ;;  %v577_v41 = vsel %vm248_vm0, %v524_v29, -inf  ;;  %v431_v42 = vmax.f32 %v429_v32, %v430_v37 }
  0x6d   : > { %v433_v43 = vsel %vm248_vm0, %v245_v26, -inf  ;;  %v525_v44 = vsel %vm248_vm0, %v407_v30, -inf  ;;  %v238_v45 = vld [vmem:[%s863_s23 + $0xec] sm:$0x3]  ;;  %v578_v46 = vmax.f32 %v576_v35, %v577_v41  ;;  %v528_v48 = vsel %vm248_vm0, %v410_v36, -inf }
  0x6e   : > { %v434_v47 = vmax.f32 %v432_v38, %v433_v43  ;;  %v239_v49 = vld [vmem:[%s863_s23 + $0xee] sm:$0x3]  ;;  %v246_v50 = vld [vmem:[%s863_s23 + $0xfc] sm:$0x3]  ;;  %v411_v51 = vsel %vm248_vm0, %v174_v33, -inf  ;;  %v526_v52 = vsel %vm248_vm0, %v431_v42, -inf }
  0x6f   : > { %v247_v53 = vld [vmem:[%s863_s23 + $0xfe] sm:$0x3]  ;;  %v412_v54 = vsel %vm248_vm0, %v238_v45, -inf  ;;  %v414_v55 = vsel %vm248_vm0, %v175_v34, -inf  ;;  %v415_v56 = vsel %vm248_vm0, %v239_v49, -inf  ;;  %v527_v57 = vmax.f32 %v525_v44, %v526_v52 }
  0x70   : > { %598 = vst.msk [vmem:[%s919_s25 + $0x1a] sm:$0x3] %vm248_vm0, %v578_v46  ;;  %v529_v58 = vsel %vm248_vm0, %v434_v47, -inf  ;;  %v413_v59 = vmax.f32 %v411_v51, %v412_v54  ;;  %v416_v60 = vmax.f32 %v414_v55, %v415_v56  ;;  %v435_v62 = vsel %vm248_vm0, %v182_v39, -inf }
  0x71   : > { %v530_v61 = vmax.f32 %v528_v48, %v529_v58  ;;  %v436_v63 = vsel %vm248_vm0, %v246_v50, -inf  ;;  %v438_v0 = vsel %vm248_vm0, %v183_v40, -inf  ;;  %v579_v1 = vsel %vm248_vm0, %v527_v57, -inf }
  0x72   : > { %v437_v2 = vmax.f32 %v435_v62, %v436_v63  ;;  %v439_v3 = vsel %vm248_vm0, %v247_v53, -inf  ;;  %v531_v4 = vsel %vm248_vm0, %v413_v59, -inf  ;;  %v534_v7 = vsel %vm248_vm0, %v416_v60, -inf }
  0x73   : > { %v580_v5 = vsel %vm248_vm0, %v530_v61, -inf  ;;  %v440_v6 = vmax.f32 %v438_v0, %v439_v3 }
  0x74   : > { %v581_v8 = vmax.f32 %v579_v1, %v580_v5  ;;  %v532_v9 = vsel %vm248_vm0, %v437_v2, -inf }
  0x75   : > { %v533_v10 = vmax.f32 %v531_v4, %v532_v9  ;;  %v535_v11 = vsel %vm248_vm0, %v440_v6, -inf }
  0x76   : > { %599 = vst.msk [vmem:[%s919_s25 + $0x1c] sm:$0x3] %vm248_vm0, %v581_v8  ;;  %v536_v12 = vmax.f32 %v534_v7, %v535_v11 }
  0x77   : > { %v582_v13 = vsel %vm248_vm0, %v533_v10, -inf }
  0x78   : > { %v583_v14 = vsel %vm248_vm0, %v536_v12, -inf }
  0x79   : > { %v584_v15 = vmax.f32 %v582_v13, %v583_v14 }
  0x7b   : > { %600 = vst.msk [vmem:[%s919_s25 + $0x1e] sm:$0x3] %vm248_vm0, %v584_v15 }
  0x7c   : > { %746 = shalt.err (!%p743_p3)
}
  0x7d   : > { %s747_s11 = scalar_lea.hbm %s1259_s30, 512  ;;  %s751_s18 = scalar_lea.hbm %s1309_s1, 1536 }
  0x7e   : > { %p748_p4 = scmp.ne.s32.totalorder %s1259_s30, %s747_s11  ;;  %p752_p9 = scmp.lt.u32.totalorder %s1259_s30, %s1309_s1 }
  0x7f   : > { %p753_p10 = scmp.lt.u32.totalorder %s751_s18, %s747_s11  ;;  %p755_p12 = scmp.lt.u32.totalorder %s747_s11, %s1259_s30 }
  0x80   : > { %p749_p7 = pnand %p748_p4, %p848_p5 }
  0x81   : > { %p754_p11 = por %p753_p10, %p752_p9 }
  0x82   : > { %p750_p8 = pneg %p749_p7 }
  0x83   : > { %p756_p13 = por %p755_p12, %p754_p11 }
  0x85   : > { %p757_p0 = pnand %p756_p13, %p750_p8 }
  0x87   : > { %760 = shalt.err (!%p757_p0)
}
  0x88   : > { %s798_s21 = smov 32   ;;  %s799_s22 = smov 2  }
  0x89   : > { %692 = dma.vmem_to_hbm [thread:$0]  (%p848_p5), %s1261_s27, 512, %s1259_s30, %s1267_s2, %s798_s21, %s798_s21, %s799_s22  }
  0x8a PF: > { %p698_p1 = scmp.ge.s32.totalorder %s795_s9, 2  ;;  %s630_s23 = sand.u32 1, %s783_s6  }
  0x8b   : > { %s631_s24 = scalar_lea.sflag [#allocation3], %s630_s23 }
  0x8c   : > { %p695_p2 = pnand %p698_p1, %p852_p6 }
  0x8e   : > { %778 = dma.done.wait (!%p695_p2), %s631_s24, 512  }
  0x8f   : > { %780 = vsyncadd (!%p695_p2), %s631_s24, 4294966784  ;;  %p11_p3 = scmp.ge.s32.totalorder %s835_s12, 5   ;;  %s1312_s6 = smov %s787_s7 }
  0x90   : > { %s1313_s7 = smov %s791_s8  ;;  %s1314_s8 = smov %s846_s15 }
  0x91   : > { %s1315_s9 = smov %s835_s12  ;;  %13 = sbr.rel (!%p11_p3) target bundleno = 3 (0x3), region = 59 }
  0x98   :  { %636 = vsyncpa [#allocation3], 1 }
  0x99   :  { %638 = vsyncpa [#allocation3 + $0x1], 1 }

</bundles_post_ra>
